<compile_context>
chip_gen: v7x
topology: tpu7x:2x2x1
jax: 0.10.0
libtpu: 0.0.40
codegen_flags: <defaults>
</compile_context>

<pallas_src>
import functools

import jax
import jax.numpy as jnp
from jax.experimental import pallas as pl
from jax.experimental.pallas import tpu as pltpu


def _linear_kernel(w_ref, b_ref, xt_ref, o_ref):
    # w_ref : SMEM (F,)        -- weight scalars
    # b_ref : SMEM (1,)        -- bias scalar
    # xt_ref: VMEM (F, TS, TL) -- dense transposed input tile (batch on sublane x lane)
    # o_ref : VMEM (TS, TL)    -- dense, lane-wide output tile (unmasked stores)
    n_feature = xt_ref.shape[0]
    acc = jnp.full(o_ref.shape, b_ref[0], dtype=jnp.float32)
    # F is tiny for this module (linear regression): static unroll is cheapest.
    # TODO(synk): for F >~ 64 switch to an MXU jnp.dot formulation (or a
    # lax.fori_loop over a VMEM weight row) instead of F VPU passes.
    for f in range(n_feature):
        acc = acc + w_ref[f] * xt_ref[f].astype(jnp.float32)
    o_ref[...] = acc.astype(o_ref.dtype)


def _round_up(x, m):
    return ((x + m - 1) // m) * m


def _vmem_capacity_bytes():
    try:
        return int(pltpu.get_tpu_info().vmem_capacity_bytes)
    except Exception:
        return 64 << 20  # conservative fallback = v7x per-TC VMEM


@functools.partial(jax.jit, static_argnames=("lane_tile",))
def linear_net_forward(x, weight, bias, *, lane_tile=1024):
    """x: (B, F) f32, weight: (1, F) f32 (PyTorch layout), bias: (1,) f32 -> (B, 1)."""
    B, F = x.shape

    # ---- Tile geometry ---------------------------------------------------
    # Batch -> (sublane, lane) = (S, TL): TL multiple of 128, TS multiple of 8.
    TL = min(lane_tile, _round_up(B, 128))        # lanes per row
    BP = _round_up(B, TL)                         # batch padded to whole lane-rows only
    S = BP // TL                                  # total sublane rows

    # Size the sublane tile from the VMEM budget: double-buffered
    # (input block F*TS*TL*4 + output block TS*TL*4) must fit with headroom.
    vmem_cap = _vmem_capacity_bytes()
    budget = min(vmem_cap // 4, 48 << 20)
    max_block_elems = max(8 * 128, budget // (2 * (F + 1) * 4))
    ts_cap = max(8, (max_block_elems // TL) // 8 * 8)
    if S <= ts_cap:
        TS = S                                    # single block: full extent is always legal
    else:
        TS = ts_cap                               # multiple of 8; last block ragged & masked
    grid = (pl.cdiv(S, TS),)

    # ---- Host-side layout plumbing (fuses into one copy under jit) --------
    # TODO(synk): accept x already in (F, B) layout from the producer to avoid
    # materializing the transpose of this memory-bound op.
    xt = jnp.transpose(x)                         # (F, B)
    if BP != B:
        xt = jnp.pad(xt, ((0, 0), (0, BP - B)))   # pads < TL elements per feature row
    xt3 = xt.reshape(F, S, TL)

    w = weight.reshape(F).astype(jnp.float32)     # scalars for SMEM
    b = bias.reshape(1).astype(jnp.float32)

    block_bytes = (F + 1) * TS * TL * 4
    vmem_limit = int(min(vmem_cap, 2 * block_bytes + (8 << 20)))

    out = pl.pallas_call(
        _linear_kernel,
        out_shape=jax.ShapeDtypeStruct((S, TL), x.dtype),
        grid=grid,
        in_specs=[
            pl.BlockSpec(memory_space=pltpu.MemorySpace.SMEM),   # weight scalars
            pl.BlockSpec(memory_space=pltpu.MemorySpace.SMEM),   # bias scalar
            pl.BlockSpec((F, TS, TL), lambda i: (0, i, 0)),      # dense x^T tile
        ],
        out_specs=pl.BlockSpec((TS, TL), lambda i: (i, 0)),
        compiler_params=pltpu.CompilerParams(
            # TODO(synk): on v7x use pltpu.CORE_PARALLEL (or pl.core_map over a
            # 2-core tensorcore mesh) on this axis to engage both TensorCores.
            dimension_semantics=("parallel",),
            vmem_limit_bytes=vmem_limit,
        ),
        cost_estimate=pl.CostEstimate(
            flops=2 * B * F,
            transcendentals=0,
            bytes_accessed=4 * (B * F + B),
        ),
    )(w, b, xt3)

    # Drop padding, return in PyTorch's (B, 1) layout.
    return out.reshape(BP)[:B].reshape(B, 1)


if __name__ == "__main__":
    key = jax.random.PRNGKey(0)
    kx, kw, kb = jax.random.split(key, 3)

    # 1) Small shapes matching the classic linear-regression setup: batch=8, n_feature=2.
    B, F = 8, 2
    x = jax.random.normal(kx, (B, F), dtype=jnp.float32)
    bound = 1.0 / jnp.sqrt(jnp.float32(F))
    weight = jax.random.uniform(kw, (1, F), minval=-bound, maxval=bound, dtype=jnp.float32)
    bias = jax.random.uniform(kb, (1,), minval=-bound, maxval=bound, dtype=jnp.float32)

    y = linear_net_forward(x, weight, bias)
    jax.block_until_ready(y)
    y_ref = x @ weight.T + bias
    assert y.shape == (B, 1)
    assert jnp.allclose(y, y_ref, atol=1e-5), "mismatch vs reference (small)"

    # 2) Non-multiple-of-128 batch (exercises the lane-row padding path).
    B2, F2 = 1000, 5
    k2x, k2w, k2b = jax.random.split(jax.random.PRNGKey(1), 3)
    x2 = jax.random.normal(k2x, (B2, F2), dtype=jnp.float32)
    bound2 = 1.0 / jnp.sqrt(jnp.float32(F2))
    w2 = jax.random.uniform(k2w, (1, F2), minval=-bound2, maxval=bound2, dtype=jnp.float32)
    b2 = jax.random.uniform(k2b, (1,), minval=-bound2, maxval=bound2, dtype=jnp.float32)

    y2 = linear_net_forward(x2, w2, b2)
    jax.block_until_ready(y2)
    y2_ref = x2 @ w2.T + b2
    assert y2.shape == (B2, 1)
    assert jnp.allclose(y2, y2_ref, atol=1e-4), "mismatch vs reference (padded)"

    # 3) Large batch: multi-block grid with a ragged (masked) last sublane block.
    B3, F3 = 3_000_000, 2
    k3x, k3w, k3b = jax.random.split(jax.random.PRNGKey(2), 3)
    x3 = jax.random.normal(k3x, (B3, F3), dtype=jnp.float32)
    bound3 = 1.0 / jnp.sqrt(jnp.float32(F3))
    w3 = jax.random.uniform(k3w, (1, F3), minval=-bound3, maxval=bound3, dtype=jnp.float32)
    b3 = jax.random.uniform(k3b, (1,), minval=-bound3, maxval=bound3, dtype=jnp.float32)

    y3 = linear_net_forward(x3, w3, b3)
    jax.block_until_ready(y3)
    y3_ref = x3 @ w3.T + b3
    assert y3.shape == (B3, 1)
    assert jnp.allclose(y3, y3_ref, atol=1e-4), "mismatch vs reference (tiled/ragged)"

    print("KERNEL_OK")
</pallas_src>

<mosaic_0001>
module attributes {stable_mosaic.version = 11 : i64} {
  func.func @_linear_kernel(%arg0: i32, %arg1: memref<2xf32, #tpu.memory_space<smem>>, %arg2: memref<1xf32, #tpu.memory_space<smem>>, %arg3: memref<2x1x128xf32, #tpu.memory_space<vmem>>, %arg4: memref<1x128xf32, #tpu.memory_space<vmem>>) attributes {dimension_semantics = [#tpu.dimension_semantics<parallel>], iteration_bounds = array<i64: 1>, scalar_prefetch = 0 : i64, scratch_operands = 0 : i64, tpu.core_type = #tpu.core_type<tc>, window_params = [{transform_indices = @transform_0, window_bounds = array<i64: 2>}, {transform_indices = @transform_1, window_bounds = array<i64: 1>}, {transform_indices = @transform_2, window_bounds = array<i64: 2, 1, 128>}, {transform_indices = @transform_3, window_bounds = array<i64: 1, 128>}]} {
    %c0 = arith.constant 0 : index
    %0 = memref.load %arg2[%c0] : memref<1xf32, #tpu.memory_space<smem>>
    %1 = vector.broadcast %0 : f32 to vector<1x128xf32>
    %c0_0 = arith.constant 0 : index
    %2 = memref.load %arg1[%c0_0] : memref<2xf32, #tpu.memory_space<smem>>
    %c0_1 = arith.constant 0 : index
    %c0_2 = arith.constant 0 : index
    %c0_3 = arith.constant 0 : index
    %3 = vector.load %arg3[%c0_1, %c0_2, %c0_3] : memref<2x1x128xf32, #tpu.memory_space<vmem>>, vector<1x1x128xf32>
    %4 = vector.shape_cast %3 : vector<1x1x128xf32> to vector<1x128xf32>
    %5 = vector.broadcast %2 : f32 to vector<1x128xf32>
    %6 = arith.mulf %5, %4 : vector<1x128xf32>
    %7 = arith.addf %1, %6 : vector<1x128xf32>
    %c1 = arith.constant 1 : index
    %8 = memref.load %arg1[%c1] : memref<2xf32, #tpu.memory_space<smem>>
    %c1_4 = arith.constant 1 : index
    %c0_5 = arith.constant 0 : index
    %c0_6 = arith.constant 0 : index
    %9 = vector.load %arg3[%c1_4, %c0_5, %c0_6] : memref<2x1x128xf32, #tpu.memory_space<vmem>>, vector<1x1x128xf32>
    %10 = vector.shape_cast %9 : vector<1x1x128xf32> to vector<1x128xf32>
    %11 = vector.broadcast %8 : f32 to vector<1x128xf32>
    %12 = arith.mulf %11, %10 : vector<1x128xf32>
    %13 = arith.addf %7, %12 : vector<1x128xf32>
    %c0_7 = arith.constant 0 : index
    %c0_8 = arith.constant 0 : index
    %14 = vector.load %arg4[%c0_7, %c0_8] : memref<1x128xf32, #tpu.memory_space<vmem>>, vector<1x128xf32>
    tpu.vector_store %arg4[%c0_7, %c0_8], %13 {strides = array<i32>} : memref<1x128xf32, #tpu.memory_space<vmem>>, vector<1x128xf32>,
    return
  }
  func.func @transform_0(%arg0: i32) -> i32 {
    %c0_i32 = arith.constant 0 : i32
    %c0_i32_0 = arith.constant 0 : i32
    return %c0_i32 : i32
  }
  func.func @transform_1(%arg0: i32) -> i32 {
    %c0_i32 = arith.constant 0 : i32
    %c0_i32_0 = arith.constant 0 : i32
    return %c0_i32 : i32
  }
  func.func @transform_2(%arg0: i32) -> (i32, i32, i32) {
    %c0_i32 = arith.constant 0 : i32
    %c0_i32_0 = arith.constant 0 : i32
    %c0_i32_1 = arith.constant 0 : i32
    return %c0_i32, %arg0, %c0_i32_0 : i32, i32, i32
  }
  func.func @transform_3(%arg0: i32) -> (i32, i32) {
    %c0_i32 = arith.constant 0 : i32
    %c0_i32_0 = arith.constant 0 : i32
    return %arg0, %c0_i32 : i32, i32
  }
}

</mosaic_0001>

<bundles_post_ra>
// kernel: linear_net_forward.1
= control target key start
LH: loop header
LB: loop body
LE: loop exit
PB: predicated region body
PF: predicated region fallthrough
CT: control target
= control target key end

     0   :  { %9 = vsyncpa [#allocation4], 0  ;;  %s100_s0 = inlined_call_operand.vmem [shape: f32[2], index: 0, kind: input, shape index: {}]   ;;  %s101_s1 = inlined_call_operand.<no memory space> [shape: f32[1], index: 1, kind: input, shape index: {}]   ;;  %s102_s2 = inlined_call_operand.vmem [shape: f32[2,1,128], index: 2, kind: input, shape index: {}]   ;;  %s103_s3 = inlined_call_operand.vmem [shape: f32[1,128], index: 3, kind: output, shape index: {}]  }
   0x1   :  { %s16_s14 = sshll.u32 %s100_s0, 4  ;;  %s17_s14 = int_to_ptr.vmem [resolvable:$true] %s16_s14 }
   0x2   :  { %s50_s15 = scalar_lea.vmem %s17_s14, 16  ;;  %p55_p1 = scmp.lt.s32.totalorder %s17_s14, %s17_s14 }
   0x3   :  { %p51_p0 = scmp.ne.s32.totalorder %s17_s14, %s50_s15  ;;  %p56_p2 = scmp.lt.s32.totalorder %s50_s15, %s50_s15 }
   0x5   :  { %p57_p3 = por %p56_p2, %p55_p1 }
   0x7   :  { %p58_p4 = pnand %p57_p3, %p51_p0 }
   0x9   :  { %61 = shalt.err (!%p58_p4)
}
   0xa   :  { %s64_s16 = smov [#allocation3]  }
   0xb   :  { %19 = dma.vmem_to_smem %s17_s14, 16, %s64_s16, [#allocation4]  }
   0xc   :  { %62 = dma.done.wait [#allocation4], 16  }
   0xd   :  { %63 = vsyncadd [#allocation4], 4294967280 }
   0xe   :  { %27 = sfence }
   0xf   :  { %s30_s17 = sld [smem:[#allocation3]]  ;;  %s47_s18 = sld [smem:[#allocation3 + $0x1]]  ;;  %v31_v0 = vld [vmem:[%s102_s2] sm:$0x1]  ;;  %v48_v1 = vld [vmem:[%s102_s2 + $0x1] sm:$0x1]  ;;  %v29_v2 = vstv %s101_s1 }
  0x15   :  { %v32_v3 = vstv %s30_s17  ;;  %v38_v4 = vstv %s47_s18 }
  0x16   :  { %v33_v5 = vmul.f32 %v32_v3, %v31_v0  ;;  %v39_v6 = vmul.f32 %v48_v1, %v38_v4 }
  0x18   :  { %v34_v7 = vadd.f32 %v33_v5, %v29_v2 }
  0x1a   :  { %v40_v8 = vadd.f32 %v39_v6, %v34_v7 }
  0x1c   :  { %41 = vst [vmem:[%s103_s3] sm:$0x1] %v40_v8 }
  0x1d   :  { %46 = vsyncpa [#allocation4], 1 }

</bundles_post_ra>
